<compile_context>
chip_gen: v7x
topology: tpu7x:2x2x1
jax: 0.10.0
libtpu: 0.0.40
codegen_flags: <defaults>
</compile_context>

<pallas_src>
import jax
import jax.numpy as jnp
from jax.experimental import pallas as pl
from jax.experimental.pallas import tpu as pltpu


def _concat_pwconv_kernel(x_ref, w_ref, b_ref, o_ref):
    # x_ref: (BN, C, TS)   BN packed batch rows, TS spatial positions on lanes
    # w_ref: (C, C)        PyTorch Conv3d weight (C_out, C_in), 1x1x1 squeezed
    # b_ref: (C, 1)        f32 bias column (broadcast over lanes)
    # o_ref: (BN, 2C, TS)  rows [0,C) = x (identity half), rows [C,2C) = fn(x)
    bn, c, _ = x_ref.shape
    w = w_ref[...]
    b = b_ref[...]                      # stays f32
    # bn is small and static -> unrolled; each row is an independent 2D MXU
    # matmul with the big S axis lane-dense.
    for i in range(bn):
        xi = x_ref[i]                   # (C, TS)
        yi = jnp.dot(w, xi, preferred_element_type=jnp.float32) + b
        # Channel concat (dim=1 of NCDHW) as two stores.  TS is a multiple of
        # 128, so these are lane-dense; if C is not a multiple of the sublane
        # pack (8 f32 / 16 bf16) the boundary rows become masked stores — a
        # perf, not correctness, cost.  Do not "fix" by splitting differently.
        o_ref[i, :c, :] = xi.astype(o_ref.dtype)
        o_ref[i, c:, :] = yi.astype(o_ref.dtype)


def _select_tiling(n, c, s, itemsize):
    """Pick (bn, tile_s, vmem_limit_bytes) for the streaming grid."""
    try:
        vmem_cap = int(pltpu.get_tpu_info().vmem_capacity_bytes)
    except Exception:
        vmem_cap = 64 * 1024 * 1024     # conservative (v7x-sized) fallback

    if vmem_cap <= 64 * 1024 * 1024:
        # v7x: only 64 MiB VMEM, but ~3.2 TB/s HBM -> need bigger steps to
        # amortize the ~0.35 us per-step overhead; stay <= ~44 MiB footprint.
        vmem_budget = 44 * 1024 * 1024
        target_step_bytes = 8 * 1024 * 1024
    else:
        # v5e / v6e: 128 MiB physical VMEM -> go well past the default 16/32
        # MiB scoped clamp so per-step bytes stay large.
        vmem_budget = 80 * 1024 * 1024
        target_step_bytes = 4 * 1024 * 1024

    param_bytes = (c * c + c) * 4
    # HBM bytes moved per grid step: read C*bn*tile_s, write 2C*bn*tile_s.
    # Double-buffered in VMEM -> footprint ~ 2x that (+ resident params).
    row_bytes = 3 * c * itemsize
    max_step_bytes = max(row_bytes * 128, (vmem_budget - param_bytes) // 2)

    s128 = ((s + 127) // 128) * 128
    tile_s = min(s128, max(128, (max_step_bytes // row_bytes) // 128 * 128))

    bn = 1
    if tile_s >= s128:
        tile_s = s128
        step_bytes = row_bytes * tile_s
        if step_bytes < target_step_bytes:
            # A full-S tile is still tiny (small S and/or C): pack batch rows.
            bn = min(n, 8,
                     max(1, target_step_bytes // step_bytes),
                     max(1, max_step_bytes // step_bytes))

    # Keep enough grid steps for v7x's two TensorCores + pipelining.
    def grid_pts(bn_, ts_):
        return (-(-n // bn_)) * (-(-s // ts_))

    while grid_pts(bn, tile_s) < 8:
        if bn > 1:
            bn = max(1, bn // 2)
        elif tile_s > 128:
            tile_s = max(128, ((tile_s // 2) // 128) * 128)
        else:
            break

    return int(bn), int(tile_s), int(vmem_budget)


def concat_pointwise_conv(x_ncdhw, weight, bias):
    """Concat(Conv3d(C, C, kernel_size=1)) forward.

    Args:
      x_ncdhw: (N, C, D, H, W) array (PyTorch NCDHW layout).
      weight:  (C_out, C_in) = (C, C), Conv3d weight squeezed of 1x1x1 dims.
      bias:    (C,)
    Returns:
      (N, 2C, D, H, W)
    """
    n, c, d, h, w = x_ncdhw.shape
    assert weight.shape == (c, c), weight.shape
    assert bias.shape == (c,), bias.shape
    s = d * h * w
    itemsize = jnp.dtype(x_ncdhw.dtype).itemsize

    # Keep NCDHW: (N,C,D,H,W) -> (N,C,S) is a contiguous (free) reshape, so
    # the big spatial axis S lands on the 128-lane axis.  No HBM transposes,
    # no padding, no output slice.
    x3 = x_ncdhw.reshape(n, c, s)

    bn, tile_s, vmem_limit = _select_tiling(n, c, s, itemsize)
    grid = (pl.cdiv(n, bn), pl.cdiv(s, tile_s))

    # y = W @ x matches PyTorch's (C_out, C_in) weight directly.  Weight is
    # fed to the MXU in the activation dtype; bias stays f32 (the add happens
    # on the f32 accumulator, matching a PyTorch f32-parameter Conv3d).
    w_mat = weight.astype(x_ncdhw.dtype)
    b_col = bias.reshape(c, 1).astype(jnp.float32)

    cost = pl.CostEstimate(
        flops=2 * n * c * c * s,
        transcendentals=0,
        bytes_accessed=3 * n * c * s * itemsize + c * c * itemsize + c * 4,
    )

    out3 = pl.pallas_call(
        _concat_pwconv_kernel,
        out_shape=jax.ShapeDtypeStruct((n, 2 * c, s), x_ncdhw.dtype),
        grid_spec=pl.GridSpec(
            grid=grid,
            in_specs=[
                # x: bn batch rows, all channels, one S tile.  Ragged last
                # blocks (batch or S) are handled by Pallas: OOB reads are
                # unspecified, OOB writes masked — safe since nothing mixes
                # along batch or S.
                pl.BlockSpec((bn, c, tile_s), lambda bi, si: (bi, 0, si)),
                # weight / bias stay resident (same block every step).
                pl.BlockSpec((c, c), lambda bi, si: (0, 0)),
                pl.BlockSpec((c, 1), lambda bi, si: (0, 0)),
            ],
            out_specs=pl.BlockSpec((bn, 2 * c, tile_s),
                                   lambda bi, si: (bi, 0, si)),
        ),
        compiler_params=pltpu.CompilerParams(
            dimension_semantics=("parallel", "parallel"),
            vmem_limit_bytes=vmem_limit,
        ),
        cost_estimate=cost,
    )(x3, w_mat, b_col)

    # Contiguous reshape back to NCDHW with doubled channels (no transpose).
    return out3.reshape(n, 2 * c, d, h, w)


def _reference(x_ncdhw, weight, bias):
    # pure-JAX reference of cat([x, conv1x1x1(x)], dim=1)
    y = jnp.einsum('ncdhw,oc->nodhw', x_ncdhw, weight) \
        + bias[None, :, None, None, None]
    return jnp.concatenate([x_ncdhw, y], axis=1)


if __name__ == "__main__":
    key = jax.random.PRNGKey(0)
    k_x, k_w, k_b = jax.random.split(key, 3)

    # small shapes: batch=2, channels=4, spatial=(4, 8, 8)  -> S = 256
    N, C, D, H, W = 2, 4, 4, 8, 8
    x = jax.random.normal(k_x, (N, C, D, H, W), dtype=jnp.float32)
    # deterministic synthetic Conv3d(C, C, kernel_size=1) parameters
    weight = jax.random.normal(k_w, (C, C), dtype=jnp.float32) * 0.1   # (C_out, C_in)
    bias = jax.random.normal(k_b, (C,), dtype=jnp.float32) * 0.1

    out = concat_pointwise_conv(x, weight, bias)
    out = jax.block_until_ready(out)

    ref = _reference(x, weight, bias)
    assert out.shape == (N, 2 * C, D, H, W), out.shape
    assert jnp.allclose(out, ref, atol=1e-5, rtol=1e-5), "mismatch vs reference"

    print("KERNEL_OK")
</pallas_src>

<mosaic_0001>
module attributes {stable_mosaic.version = 11 : i64} {
  func.func @_concat_pwconv_kernel(%arg0: i32, %arg1: i32, %arg2: memref<1x4x128xf32, #tpu.memory_space<vmem>>, %arg3: memref<4x4xf32, #tpu.memory_space<vmem>>, %arg4: memref<4x1xf32, #tpu.memory_space<vmem>>, %arg5: memref<1x8x128xf32, #tpu.memory_space<vmem>>) attributes {dimension_semantics = [#tpu.dimension_semantics<parallel>, #tpu.dimension_semantics<parallel>], iteration_bounds = array<i64: 2, 2>, scalar_prefetch = 0 : i64, scratch_operands = 0 : i64, tpu.core_type = #tpu.core_type<tc>, window_params = [{transform_indices = @transform_0, window_bounds = array<i64: 1, 4, 128>}, {pipeline_mode = #tpu.pipeline_mode<synchronous>, transform_indices = @transform_1, window_bounds = array<i64: 4, 4>}, {pipeline_mode = #tpu.pipeline_mode<synchronous>, transform_indices = @transform_2, window_bounds = array<i64: 4, 1>}, {transform_indices = @transform_3, window_bounds = array<i64: 1, 8, 128>}]} {
    %c0 = arith.constant 0 : index
    %c0_0 = arith.constant 0 : index
    %0 = vector.load %arg3[%c0, %c0_0] : memref<4x4xf32, #tpu.memory_space<vmem>>, vector<4x4xf32>
    %c0_1 = arith.constant 0 : index
    %c0_2 = arith.constant 0 : index
    %1 = vector.load %arg4[%c0_1, %c0_2] : memref<4x1xf32, #tpu.memory_space<vmem>>, vector<4x1xf32>
    %c0_3 = arith.constant 0 : index
    %c0_4 = arith.constant 0 : index
    %c0_5 = arith.constant 0 : index
    %2 = vector.load %arg2[%c0_3, %c0_4, %c0_5] : memref<1x4x128xf32, #tpu.memory_space<vmem>>, vector<1x4x128xf32>
    %3 = vector.shape_cast %2 : vector<1x4x128xf32> to vector<4x128xf32>
    %cst = arith.constant dense<0.000000e+00> : vector<4x128xf32>
    %4 = tpu.matmul %0, %3, %cst {dimension_numbers = #tpu.dot_dimension_numbers<[1], [0], [0], [1], [0, 0, 1, 1], [], []>} : vector<4x4xf32>, vector<4x128xf32>, vector<4x128xf32> -> vector<4x128xf32>
    %5 = vector.broadcast %1 : vector<4x1xf32> to vector<4x128xf32>
    %6 = arith.addf %4, %5 : vector<4x128xf32>
    %c0_6 = arith.constant 0 : index
    %c0_7 = arith.constant 0 : index
    %c0_8 = arith.constant 0 : index
    %7 = vector.load %arg5[%c0_6, %c0_7, %c0_8] : memref<1x8x128xf32, #tpu.memory_space<vmem>>, vector<1x4x128xf32>
    %8 = vector.shape_cast %7 : vector<1x4x128xf32> to vector<4x128xf32>
    %9 = vector.shape_cast %3 : vector<4x128xf32> to vector<1x4x128xf32>
    tpu.vector_store %arg5[%c0_6, %c0_7, %c0_8], %9 {strides = array<i32>} : memref<1x8x128xf32, #tpu.memory_space<vmem>>, vector<1x4x128xf32>,
    %c0_9 = arith.constant 0 : index
    %c4 = arith.constant 4 : index
    %c0_10 = arith.constant 0 : index
    %10 = vector.load %arg5[%c0_9, %c4, %c0_10] : memref<1x8x128xf32, #tpu.memory_space<vmem>>, vector<1x4x128xf32>
    %11 = vector.shape_cast %10 : vector<1x4x128xf32> to vector<4x128xf32>
    %12 = vector.shape_cast %6 : vector<4x128xf32> to vector<1x4x128xf32>
    tpu.vector_store %arg5[%c0_9, %c4, %c0_10], %12 {strides = array<i32>} : memref<1x8x128xf32, #tpu.memory_space<vmem>>, vector<1x4x128xf32>,
    return
  }
  func.func @transform_0(%arg0: i32, %arg1: i32) -> (i32, i32, i32) {
    %c0_i32 = arith.constant 0 : i32
    %c0_i32_0 = arith.constant 0 : i32
    return %arg0, %c0_i32, %arg1 : i32, i32, i32
  }
  func.func @transform_1(%arg0: i32, %arg1: i32) -> (i32, i32) {
    %c0_i32 = arith.constant 0 : i32
    %c0_i32_0 = arith.constant 0 : i32
    %c0_i32_1 = arith.constant 0 : i32
    return %c0_i32, %c0_i32_0 : i32, i32
  }
  func.func @transform_2(%arg0: i32, %arg1: i32) -> (i32, i32) {
    %c0_i32 = arith.constant 0 : i32
    %c0_i32_0 = arith.constant 0 : i32
    %c0_i32_1 = arith.constant 0 : i32
    return %c0_i32, %c0_i32_0 : i32, i32
  }
  func.func @transform_3(%arg0: i32, %arg1: i32) -> (i32, i32, i32) {
    %c0_i32 = arith.constant 0 : i32
    %c0_i32_0 = arith.constant 0 : i32
    return %arg0, %c0_i32, %arg1 : i32, i32, i32
  }
}

</mosaic_0001>

<bundles_post_ra>
// kernel: tpu_custom_call.1
= control target key start
LH: loop header
LB: loop body
LE: loop exit
PB: predicated region body
PF: predicated region fallthrough
CT: control target
= control target key end

     0   :  { %8 = vsyncpa [#allocation3], 0  ;;  %s855_s0 = inlined_call_operand.hbm [shape: f32[2,4,256], index: 0, kind: input, shape index: {}]   ;;  %s856_s1 = inlined_call_operand.vmem [shape: f32[4,4], index: 1, kind: input, shape index: {}]   ;;  %s857_s2 = inlined_call_operand.vmem [shape: f32[4,1], index: 2, kind: input, shape index: {}]   ;;  %s858_s3 = inlined_call_operand.hbm [shape: f32[2,8,256], index: 3, kind: output, shape index: {}]  }
   0x1   :  { %10 = vsyncpa [#allocation3 + $0x1], 0 }
   0x2   :  { %11 = vsyncpa [#allocation4], 0 }
   0x3   :  { %13 = vsyncpa [#allocation4 + $0x1], 0  ;;  %s654_s12 = smov 0   ;;  %s656_s13 = smov 0  }
   0x4   :  { %s658_s14 = smov 0   ;;  %s660_s15 = smov 0  }
   0x5   :  { %s662_s16 = smov 0   ;;  %s664_s17 = smov 0  }
   0x6   :  { %s666_s18 = smov 0   ;;  %s668_s19 = smov 0  }
   0x7 LB: > { %s393_s20 = sadd.s32 4294967295, %s627_s19   ;;  %s394_s21 = sadd.s32 4294967294, %s627_s19   ;;  %s627_s19 = sphi %s668_s19, %s19_s19   ;;  %s623_s18 = sphi %s666_s18, %s875_s18   ;;  %s619_s17 = sphi %s664_s17, %s874_s17   ;;  %s615_s16 = sphi %s662_s16, %s873_s16   ;;  %s611_s15 = sphi %s660_s15, %s872_s15   ;;  %s607_s14 = sphi %s658_s14, %s871_s14   ;;  %s603_s13 = sphi %s656_s13, %s870_s13   ;;  %s599_s12 = sphi %s654_s12, %s869_s12  }
   0x8   : > { %s28_s22 = sadd.s32 1, %s619_s17  ;;  %s31_s23 = sadd.s32 1, %s623_s18 }
   0x9   : > { %p29_p0 = scmp.ge.s32.totalorder %s28_s22, 2  ;;  %s40_s24 = sadd.s32 1, %s607_s14 }
   0xa   : > { %p47_p1 = scmp.ne.s32.totalorder %s607_s14, %s603_s13  ;;  %p48_p2 = scmp.eq.s32.totalorder %s627_s19, 0 }
   0xb   : > { %s877_s22 = smov (%p29_p0, %s28_s22), 0  ;;  %s879_s23 = smov (!%p29_p0, %s31_s23), %s623_s18 }
   0xc   : > { %s36_s25 = ssub.s32 %s619_s17, %s877_s22  ;;  %p707_p3 = por %p48_p2, %p47_p1 }
   0xd   : > { %p33_p4 = scmp.ge.s32.totalorder %s879_s23, 2  ;;  %p53_p5 = scmp.ne.s32.totalorder %s603_s13, %s599_s12 }
   0xe   : > { %p54_p6 = scmp.eq.s32.totalorder %s393_s20, 0  ;;  %p121_p7 = scmp.eq.s32.totalorder %s393_s20, 3 }
   0xf   : > { %s881_s23 = smov (%p33_p4, %s879_s23), 0  ;;  %p127_p10 = scmp.eq.s32.totalorder %s394_s21, 3 }
  0x10   : > { %p715_p8 = por %p54_p6, %p53_p5  ;;  %p719_p9 = por %p121_p7, %p47_p1 }
  0x11   : > { %s35_s29 = ssub.s32 %s623_s18, %s881_s23  ;;  %p725_p12 = por %p127_p10, %p53_p5 }
  0x12   : > { %s862_s28 = scalar_select %p719_p9, 1, 0 }
  0x13   : > { %s37_s30 = sor.u32 %s36_s25, %s35_s29  ;;  %p429_p13 = scmp.lt.s32.totalorder %s627_s19, 4 }
  0x14   : > { %p38_p11 = scmp.eq.s32.totalorder %s37_s30, 0  ;;  %s153_s5 = sand.u32 1, %s607_s14  }
  0x15   : > { %s863_s4 = scalar_select %p725_p12, 1, 0 }
  0x16   : > { %s732_s6 = scalar_select %p38_p11, %s607_s14, %s40_s24  }
  0x17   : > { %s397_s7 = sshll.u32 %s153_s5, 2  ;;  %s398_s8 = sshll.u32 %s623_s18, 1 }
  0x18   : > { %s162_s9 = sadd.s32 %s619_s17, %s398_s8  ;;  %s157_s10 = scalar_lea.vmem [#allocation2], %s397_s7 }
  0x19   : > { %s166_s11 = sshll.u32 %s157_s10, 4  ;;  %s399_s20 = sshll.u32 %s162_s9, 6  ;;  %s736_s11 = int_to_ptr.vmem [resolvable:$true] %s166_s11 }
  0x1a   : > { %s741_s29 = scalar_lea.hbm %s855_s0, %s399_s20  ;;  %p745_p0 = pnand %p429_p13, %p707_p3 }
  0x1b   : > { %s154_s30 = scalar_lea.sflag [#allocation3], %s153_s5  ;;  %s499_s7 = scalar_lea.hbm %s741_s29, 64 }
  0x1c   : > { %p500_p4 = scmp.ne.s32.totalorder %s741_s29, %s499_s7  ;;  %p501_p5 = pneg %p745_p0 }
  0x1d   : > { %s504_s9 = scalar_lea.hbm %s855_s0, 256  ;;  %p505_p3 = scmp.lt.u32.totalorder %s741_s29, %s855_s0 }
  0x1e   : > { %p502_p6 = pnand %p501_p5, %p500_p4  ;;  %p506_p10 = scmp.lt.u32.totalorder %s504_s9, %s499_s7 }
  0x1f   : > { %p508_p13 = scmp.lt.u32.totalorder %s499_s7, %s741_s29 }
  0x20   : > { %p503_p7 = pneg %p502_p6  ;;  %p507_p11 = por %p506_p10, %p505_p3 }
  0x22   : > { %p509_p1 = por %p508_p13, %p507_p11 }
  0x24   : > { %p510_p2 = pnand %p509_p1, %p503_p7 }
  0x26   : > { %513 = shalt.err (!%p510_p2)
}
  0x27   : > { %s514_s5 = scalar_lea.vmem %s736_s11, 64  ;;  %s629_s21 = smov [#allocation2]  }
  0x28   : > { %p515_p4 = scmp.ne.s32.totalorder %s736_s11, %s514_s5  ;;  %s519_s25 = sshll.u32 %s629_s21, 4  ;;  %s520_s25 = int_to_ptr.vmem [resolvable:$false] %s519_s25 }
  0x29   : > { %s521_s26 = scalar_lea.vmem %s520_s25, 128  ;;  %p522_p9 = scmp.lt.s32.totalorder %s736_s11, %s520_s25 }
  0x2a   : > { %p517_p6 = pnand %p515_p4, %p501_p5  ;;  %p523_p3 = scmp.lt.s32.totalorder %s521_s26, %s514_s5 }
  0x2c   : > { %p518_p12 = pneg %p517_p6  ;;  %p524_p10 = por %p523_p3, %p522_p9 }
  0x2e   : > { %p525_p11 = pnand %p524_p10, %p518_p12 }
  0x30   : > { %528 = shalt.err (!%p525_p11)
}
  0x31   : > { %424 = dma.hbm_to_vmem [thread:$0]  (!%p745_p0), %s741_s29, 64, %s736_s11, %s154_s30  }
  0x32   : > { %p865_p1 = scmp.lt.s32.totalorder %s627_s19, 5  ;;  %p866_p2 = scmp.ge.s32.totalorder %s627_s19, 1 }
  0x34   : > { %p172_p5 = pnand %p866_p2, %p865_p1 }
  0x35   : > { %s781_s7 = sand.u32 (!%p172_p5), 1, %s603_s13  }
  0x36   : > { %175 = sbr.rel (%p172_p5) target bundleno = 293 (0x125), region = 32  ;;  %s401_s8 = sshll.u32 (!%p172_p5), %s781_s7, 2 }
  0x37   : > { %s178_s9 = scalar_lea.sflag (!%p172_p5), [#allocation3], %s781_s7  ;;  %s181_s10 = scalar_lea.vmem (!%p172_p5), [#allocation2], %s401_s8 }
  0x3d   : > { %590 = dma.done.wait (%p715_p8), %s178_s9, 64  }
  0x3e   : > { %592 = vsyncadd (%p715_p8), %s178_s9, 4294967232  ;;  %v630_v0 = vmov 0.0   ;;  %vm631_vm0 = vmmov 0   ;;  %s402_s11 = sshll.u32 %s781_s7, 3  ;;  %v632_v1 = vmov 0   ;;  %vm216_vm1 = vcmask 1043456  }
  0x3f   : > { %412 = vmatprep.subr.mxu0 %v630_v0  ;;  %414 = vmatprep.mubr.msk.f32.mxu0 %vm631_vm0, %v630_v0  ;;  %vm212_vm2 = vcmask 31744   ;;  %v206_v2 = vld [vmem:[%s181_s10] sm:$0xf]  ;;  %s203_s20 = scalar_lea.vmem [#allocation5], %s402_s11  ;;  %s406_s5 = sshll.u32 %s615_s16, 1 }
  0x40   : > { %498 = vset.pattern.permute.xlu0 %v632_v1  ;;  %v204_v3 = vld [vmem:[%s856_s1] sm:$0xf]  ;;  %413 = vmatpush3.msk.msra.mxu0 %vm216_vm1, %v206_v2  ;;  %290 = vst [vmem:[%s203_s20] sm:$0xf] %v206_v2  ;;  %s304_s21 = sadd.s32 %s611_s15, %s406_s5  ;;  %s308_s25 = sshll.u32 %s203_s20, 4  ;;  %s803_s25 = int_to_ptr.vmem [resolvable:$true] %s308_s25 }
  0x41   : > { %v205_v4 = vld [vmem:[%s857_s2] sm:$0xf]  ;;  %415 = vmatmul.mubr.msk.f32.vlgmr.msra.gmra.mrb[0].mxu0 %vm212_vm2, %v204_v3  ;;  %s407_s26 = sshll.u32 %s304_s21, 7  ;;  %s293_s11 = scalar_lea.sflag [#allocation4], %s781_s7 }
  0x42   : > { %209 = vperm.xlu0 %498, %v205_v4   ;;  %s801_s10 = scalar_lea.hbm %s858_s3, %s407_s26  ;;  %s529_s16 = scalar_lea.vmem %s803_s25, 128 }
  0x43   : > { %p530_p8 = scmp.ne.s32.totalorder %s803_s25, %s529_s16  ;;  %p867_p9 = scmp.ne.s32.totalorder %s862_s28, 0 }
  0x44   : > { %s633_s15 = smov [#allocation5]  }
  0x45   : > { %p531_p12 = pnand %p530_p8, %p867_p9  ;;  %s533_s29 = sshll.u32 %s633_s15, 4  ;;  %s534_s29 = int_to_ptr.vmem [resolvable:$false] %s533_s29 }
  0x46   : > { %s535_s24 = scalar_lea.vmem %s534_s29, 256  ;;  %p536_p7 = scmp.lt.s32.totalorder %s803_s25, %s534_s29 }
  0x47   : > { %p532_p0 = pneg %p531_p12  ;;  %p537_p13 = scmp.lt.s32.totalorder %s535_s24, %s529_s16 }
  0x49   : > { %p538_p4 = por %p537_p13, %p536_p7 }
  0x4b   : > { %p539_p6 = pnand %p538_p4, %p532_p0 }
  0xc1   : > { %v210_v5 = vpop.permute.xlu0 %209 }
 0x114   : > { %v286_v6 = vpop.f32.mrb[0].mxu0 }
 0x115   : > { %v287_v7 = vadd.f32 %v286_v6, %v210_v5  ;;  %v416_v8 = vpop.f32.mrb[1].mxu0 }
 0x117   : > { %291 = vst [vmem:[%s203_s20 + $0x4] sm:$0xf] %v287_v7 }
 0x118   : > { %542 = shalt.err (!%p539_p6)
}
 0x119   : > { %s543_s7 = scalar_lea.hbm %s801_s10, 128  ;;  %s547_s20 = scalar_lea.hbm %s858_s3, 512 }
 0x11a   : > { %p544_p3 = scmp.ne.s32.totalorder %s801_s10, %s543_s7  ;;  %p548_p1 = scmp.lt.u32.totalorder %s801_s10, %s858_s3 }
 0x11b   : > { %p549_p2 = scmp.lt.u32.totalorder %s547_s20, %s543_s7  ;;  %p551_p8 = scmp.lt.u32.totalorder %s543_s7, %s801_s10 }
 0x11c   : > { %p545_p10 = pnand %p544_p3, %p867_p9 }
 0x11d   : > { %p550_p5 = por %p549_p2, %p548_p1 }
 0x11e   : > { %p546_p11 = pneg %p545_p10 }
 0x11f   : > { %p552_p12 = por %p551_p8, %p550_p5 }
 0x121   : > { %p553_p0 = pnand %p552_p12, %p546_p11 }
 0x123   : > { %556 = shalt.err (!%p553_p0)
}
 0x124   : > { %419 = dma.vmem_to_hbm [thread:$0]  (%p867_p9), %s803_s25, 128, %s801_s10, %s293_s11  }
 0x125 PF: > { %p430_p7 = scmp.ge.s32.totalorder %s627_s19, 2  ;;  %s320_s26 = sand.u32 1, %s599_s12  }
 0x126   : > { %p868_p13 = scmp.ne.s32.totalorder %s863_s4, 0  ;;  %s321_s8 = scalar_lea.sflag [#allocation4], %s320_s26 }
 0x128   : > { %p426_p4 = pnand %p430_p7, %p868_p13 }
 0x12a   : > { %594 = dma.done.wait (!%p426_p4), %s321_s8, 128  }
 0x12b   : > { %596 = vsyncadd (!%p426_p4), %s321_s8, 4294967168  ;;  %s19_s19 = sadd.s32 1, %s627_s19   ;;  %s869_s12 = smov %s603_s13 }
 0x12c   : > { %p16_p6 = scmp.ge.s32.totalorder %s19_s19, 6   ;;  %s870_s13 = smov %s607_s14 }
 0x12d   : > { %s871_s14 = smov %s732_s6  ;;  %s872_s15 = smov %s619_s17 }
 0x12e   : > { %s873_s16 = smov %s623_s18  ;;  %s874_s17 = smov %s877_s22 }
 0x12f   : > { %s875_s18 = smov %s881_s23  ;;  %18 = sbr.rel (!%p16_p6) target bundleno = 7 (0x7), region = 77 }
 0x136   :  { %326 = vsyncpa [#allocation3], 1 }
 0x137   :  { %328 = vsyncpa [#allocation3 + $0x1], 1 }
 0x138   :  { %329 = vsyncpa [#allocation4], 1 }
 0x139   :  { %331 = vsyncpa [#allocation4 + $0x1], 1 }

</bundles_post_ra>
